<compile_context>
chip_gen: v7x
topology: tpu7x:2x2x1
jax: 0.10.0
libtpu: 0.0.40
codegen_flags: <defaults>
</compile_context>

<pallas_src>
import jax
import jax.numpy as jnp
from jax.experimental import pallas as pl
from jax.experimental.pallas import tpu as pltpu

LANE = 128
SUBLANE = 8


def _round_up(x, m):
    return (x + m - 1) // m * m


def _mlp_kernel(x_ref, w1_ref, b1_ref, w2_ref, b2_ref, w3_ref, b3_ref, o_ref):
    """One batch tile: x (TM, Din) f32 -> o (TM, Dout) f32.

    Weights are bf16 (hidden dims lane-padded to 128), biases f32. The final
    weight/bias/output keep the true output width (16) so the store is narrow.
    """
    x = x_ref[...].astype(jnp.bfloat16)            # in-kernel cast (VPU, hidden)
    # fc1 + ReLU (bf16 MXU, f32 accumulate; ReLU on f32, re-quantize to bf16)
    h1 = jnp.dot(x, w1_ref[...], preferred_element_type=jnp.float32) + b1_ref[...]
    h1 = jnp.maximum(h1, 0.0).astype(jnp.bfloat16)
    # fc2 + ReLU
    h2 = jnp.dot(h1, w2_ref[...], preferred_element_type=jnp.float32) + b2_ref[...]
    h2 = jnp.maximum(h2, 0.0).astype(jnp.bfloat16)
    # fc3 (no activation), narrow f32 store
    o_ref[...] = (
        jnp.dot(h2, w3_ref[...], preferred_element_type=jnp.float32) + b3_ref[...]
    ).astype(o_ref.dtype)


def prepare_params(params):
    """One-time param prep (hoisted out of the per-call forward).

    params["w*"]: (in_features, out_features) f32, params["b*"]: (out_features,) f32.
    Hidden dims are zero-padded to 128 lanes; weights cast to bf16, biases kept f32.
    The final layer keeps its true output width (narrow writeback).
    """
    w1, b1 = params["w1"], params["b1"]
    w2, b2 = params["w2"], params["b2"]
    w3, b3 = params["w3"], params["b3"]

    din, f1 = w1.shape
    f2, dout = w2.shape[1], w3.shape[1]
    f1p, f2p = _round_up(f1, LANE), _round_up(f2, LANE)

    w1p = jnp.zeros((din, f1p), jnp.bfloat16).at[:, :f1].set(w1.astype(jnp.bfloat16))
    b1p = jnp.zeros((1, f1p), jnp.float32).at[:, :f1].set(b1.reshape(1, -1))
    w2p = jnp.zeros((f1p, f2p), jnp.bfloat16).at[:f1, :f2].set(w2.astype(jnp.bfloat16))
    b2p = jnp.zeros((1, f2p), jnp.float32).at[:, :f2].set(b2.reshape(1, -1))
    w3p = jnp.zeros((f2p, dout), jnp.bfloat16).at[:f2, :].set(w3.astype(jnp.bfloat16))
    b3p = b3.reshape(1, -1).astype(jnp.float32)
    return {"w1": w1p, "b1": b1p, "w2": w2p, "b2": b2p, "w3": w3p, "b3": b3p}


def _pick_batch_tile(B, tm_max):
    """Largest sublane-aligned tile <= tm_max, keeping >=2 grid steps when possible."""
    if B <= SUBLANE:
        return B                                   # single block == full array dim
    tm = _round_up(min(tm_max, _round_up(B, SUBLANE)), SUBLANE)
    if pl.cdiv(B, tm) < 2:                         # give v7x's 2nd TC some work
        tm = _round_up(pl.cdiv(B, 2), SUBLANE)
    return max(tm, SUBLANE)


def audio_embeddings_forward(x, prepped, *, tm=512):
    """x: (B, input_dim) float32; prepped: output of prepare_params()."""
    w1, b1 = prepped["w1"], prepped["b1"]
    w2, b2 = prepped["w2"], prepped["b2"]
    w3, b3 = prepped["w3"], prepped["b3"]

    B, din = x.shape
    f1p, f2p, dout = w1.shape[1], w2.shape[1], w3.shape[1]

    tm = _pick_batch_tile(B, tm)
    nb = pl.cdiv(B, tm)

    return pl.pallas_call(
        _mlp_kernel,
        out_shape=jax.ShapeDtypeStruct((B, dout), jnp.float32),
        grid=(nb,),
        in_specs=[
            pl.BlockSpec((tm, din), lambda i: (i, 0)),      # x: tile over batch (f32)
            pl.BlockSpec((din, f1p), lambda i: (0, 0)),     # weights/biases: VMEM-resident
            pl.BlockSpec((1, f1p), lambda i: (0, 0)),
            pl.BlockSpec((f1p, f2p), lambda i: (0, 0)),
            pl.BlockSpec((1, f2p), lambda i: (0, 0)),
            pl.BlockSpec((f2p, dout), lambda i: (0, 0)),
            pl.BlockSpec((1, dout), lambda i: (0, 0)),
        ],
        out_specs=pl.BlockSpec((tm, dout), lambda i: (i, 0)),  # narrow (16-wide) f32 out
        compiler_params=pltpu.CompilerParams(
            dimension_semantics=("parallel",),               # megacore shard on v7x
            vmem_limit_bytes=32 << 20,                       # fixed, ample headroom
        ),
    )(x, w1, b1, w2, b2, w3, b3)


def init_params(key, input_dim, output_dim, fc1_size=100, fc2_size=100):
    """PyTorch nn.Linear default init: U(-1/sqrt(fan_in), 1/sqrt(fan_in)).

    Weights stored as (in_features, out_features) so the kernel does x @ W.
    """
    def linear(key, fan_in, fan_out):
        kw, kb = jax.random.split(key)
        bound = 1.0 / jnp.sqrt(jnp.float32(fan_in))
        w = jax.random.uniform(kw, (fan_in, fan_out), jnp.float32, -bound, bound)
        b = jax.random.uniform(kb, (fan_out,), jnp.float32, -bound, bound)
        return w, b

    k1, k2, k3 = jax.random.split(key, 3)
    w1, b1 = linear(k1, input_dim, fc1_size)
    w2, b2 = linear(k2, fc1_size, fc2_size)
    w3, b3 = linear(k3, fc2_size, output_dim)
    return {"w1": w1, "b1": b1, "w2": w2, "b2": b2, "w3": w3, "b3": b3}


if __name__ == "__main__":
    key = jax.random.PRNGKey(0)
    kp, kx = jax.random.split(key)

    # input_dim=32, output_dim=16, fc1=fc2=100 (module defaults); batch=200
    # exercises the batch grid (tm capped to 104 -> 2 grid steps, ragged last block).
    B, input_dim, output_dim = 200, 32, 16
    params = init_params(kp, input_dim, output_dim, fc1_size=100, fc2_size=100)
    prepped = prepare_params(params)          # one-time: pad/cast weights & biases
    x = jax.random.normal(kx, (B, input_dim), jnp.float32)

    fwd = jax.jit(audio_embeddings_forward)
    out = jax.block_until_ready(fwd(x, prepped))
    assert out.shape == (B, output_dim)

    # Reference 1: exact module semantics in f32 (bf16 MXU operands -> loose tol).
    h = jnp.maximum(x @ params["w1"] + params["b1"], 0.0)
    h = jnp.maximum(h @ params["w2"] + params["b2"], 0.0)
    ref_f32 = h @ params["w3"] + params["b3"]
    assert jnp.allclose(out, ref_f32, atol=5e-2, rtol=0.0), (
        f"max abs diff vs f32 ref: {jnp.max(jnp.abs(out - ref_f32))}")

    # Reference 2: precision-matched (bf16 operands, f32 accumulation) -> tight tol.
    xb = x.astype(jnp.bfloat16)
    hb = jnp.maximum(
        jnp.dot(xb, params["w1"].astype(jnp.bfloat16),
                preferred_element_type=jnp.float32) + params["b1"], 0.0
    ).astype(jnp.bfloat16)
    hb = jnp.maximum(
        jnp.dot(hb, params["w2"].astype(jnp.bfloat16),
                preferred_element_type=jnp.float32) + params["b2"], 0.0
    ).astype(jnp.bfloat16)
    ref_bf16 = jnp.dot(hb, params["w3"].astype(jnp.bfloat16),
                       preferred_element_type=jnp.float32) + params["b3"]
    assert jnp.allclose(out, ref_bf16, atol=5e-3, rtol=0.0), (
        f"max abs diff vs bf16-matched ref: {jnp.max(jnp.abs(out - ref_bf16))}")

    print("KERNEL_OK")
</pallas_src>

<mosaic_0001>
module attributes {stable_mosaic.version = 11 : i64} {
  func.func @_mlp_kernel(%arg0: i32, %arg1: memref<104x32xf32, #tpu.memory_space<vmem>>, %arg2: memref<32x128xbf16, #tpu.memory_space<vmem>>, %arg3: memref<1x128xf32, #tpu.memory_space<vmem>>, %arg4: memref<128x128xbf16, #tpu.memory_space<vmem>>, %arg5: memref<1x128xf32, #tpu.memory_space<vmem>>, %arg6: memref<128x16xbf16, #tpu.memory_space<vmem>>, %arg7: memref<1x16xf32, #tpu.memory_space<vmem>>, %arg8: memref<104x16xf32, #tpu.memory_space<vmem>>) attributes {dimension_semantics = [#tpu.dimension_semantics<parallel>], iteration_bounds = array<i64: 2>, scalar_prefetch = 0 : i64, scratch_operands = 0 : i64, tpu.core_type = #tpu.core_type<tc>, window_params = [{transform_indices = @transform_0, window_bounds = array<i64: 104, 32>}, {pipeline_mode = #tpu.pipeline_mode<synchronous>, transform_indices = @transform_1, window_bounds = array<i64: 32, 128>}, {pipeline_mode = #tpu.pipeline_mode<synchronous>, transform_indices = @transform_2, window_bounds = array<i64: 1, 128>}, {pipeline_mode = #tpu.pipeline_mode<synchronous>, transform_indices = @transform_3, window_bounds = array<i64: 128, 128>}, {pipeline_mode = #tpu.pipeline_mode<synchronous>, transform_indices = @transform_4, window_bounds = array<i64: 1, 128>}, {pipeline_mode = #tpu.pipeline_mode<synchronous>, transform_indices = @transform_5, window_bounds = array<i64: 128, 16>}, {pipeline_mode = #tpu.pipeline_mode<synchronous>, transform_indices = @transform_6, window_bounds = array<i64: 1, 16>}, {transform_indices = @transform_7, window_bounds = array<i64: 104, 16>}]} {
    %c0 = arith.constant 0 : index
    %c0_0 = arith.constant 0 : index
    %0 = vector.load %arg1[%c0, %c0_0] : memref<104x32xf32, #tpu.memory_space<vmem>>, vector<104x32xf32>
    %1 = arith.truncf %0 : vector<104x32xf32> to vector<104x32xbf16>
    %c0_1 = arith.constant 0 : index
    %c0_2 = arith.constant 0 : index
    %2 = vector.load %arg2[%c0_1, %c0_2] : memref<32x128xbf16, #tpu.memory_space<vmem>>, vector<32x128xbf16>
    %cst = arith.constant dense<0.000000e+00> : vector<104x128xf32>
    %3 = tpu.matmul %1, %2, %cst {dimension_numbers = #tpu.dot_dimension_numbers<[1], [0], [0], [1], [0, 0, 1, 1], [], []>} : vector<104x32xbf16>, vector<32x128xbf16>, vector<104x128xf32> -> vector<104x128xf32>
    %c0_3 = arith.constant 0 : index
    %c0_4 = arith.constant 0 : index
    %4 = vector.load %arg3[%c0_3, %c0_4] : memref<1x128xf32, #tpu.memory_space<vmem>>, vector<1x128xf32>
    %5 = vector.broadcast %4 : vector<1x128xf32> to vector<104x128xf32>
    %6 = arith.addf %3, %5 : vector<104x128xf32>
    %cst_5 = arith.constant 0.000000e+00 : f32
    %7 = vector.broadcast %cst_5 : f32 to vector<104x128xf32>
    %8 = arith.maximumf %6, %7 : vector<104x128xf32>
    %9 = arith.truncf %8 : vector<104x128xf32> to vector<104x128xbf16>
    %c0_6 = arith.constant 0 : index
    %c0_7 = arith.constant 0 : index
    %10 = vector.load %arg4[%c0_6, %c0_7] : memref<128x128xbf16, #tpu.memory_space<vmem>>, vector<128x128xbf16>
    %cst_8 = arith.constant dense<0.000000e+00> : vector<104x128xf32>
    %11 = tpu.matmul %9, %10, %cst_8 {dimension_numbers = #tpu.dot_dimension_numbers<[1], [0], [0], [1], [0, 0, 1, 1], [], []>} : vector<104x128xbf16>, vector<128x128xbf16>, vector<104x128xf32> -> vector<104x128xf32>
    %c0_9 = arith.constant 0 : index
    %c0_10 = arith.constant 0 : index
    %12 = vector.load %arg5[%c0_9, %c0_10] : memref<1x128xf32, #tpu.memory_space<vmem>>, vector<1x128xf32>
    %13 = vector.broadcast %12 : vector<1x128xf32> to vector<104x128xf32>
    %14 = arith.addf %11, %13 : vector<104x128xf32>
    %cst_11 = arith.constant 0.000000e+00 : f32
    %15 = vector.broadcast %cst_11 : f32 to vector<104x128xf32>
    %16 = arith.maximumf %14, %15 : vector<104x128xf32>
    %17 = arith.truncf %16 : vector<104x128xf32> to vector<104x128xbf16>
    %c0_12 = arith.constant 0 : index
    %c0_13 = arith.constant 0 : index
    %18 = vector.load %arg6[%c0_12, %c0_13] : memref<128x16xbf16, #tpu.memory_space<vmem>>, vector<128x16xbf16>
    %cst_14 = arith.constant dense<0.000000e+00> : vector<104x16xf32>
    %19 = tpu.matmul %17, %18, %cst_14 {dimension_numbers = #tpu.dot_dimension_numbers<[1], [0], [0], [1], [0, 0, 1, 1], [], []>} : vector<104x128xbf16>, vector<128x16xbf16>, vector<104x16xf32> -> vector<104x16xf32>
    %c0_15 = arith.constant 0 : index
    %c0_16 = arith.constant 0 : index
    %20 = vector.load %arg7[%c0_15, %c0_16] : memref<1x16xf32, #tpu.memory_space<vmem>>, vector<1x16xf32>
    %21 = vector.broadcast %20 : vector<1x16xf32> to vector<104x16xf32>
    %22 = arith.addf %19, %21 : vector<104x16xf32>
    %c0_17 = arith.constant 0 : index
    %c0_18 = arith.constant 0 : index
    %23 = vector.load %arg8[%c0_17, %c0_18] : memref<104x16xf32, #tpu.memory_space<vmem>>, vector<104x16xf32>
    tpu.vector_store %arg8[%c0_17, %c0_18], %22 {strides = array<i32>} : memref<104x16xf32, #tpu.memory_space<vmem>>, vector<104x16xf32>,
    return
  }
  func.func @transform_0(%arg0: i32) -> (i32, i32) {
    %c0_i32 = arith.constant 0 : i32
    %c0_i32_0 = arith.constant 0 : i32
    return %arg0, %c0_i32 : i32, i32
  }
  func.func @transform_1(%arg0: i32) -> (i32, i32) {
    %c0_i32 = arith.constant 0 : i32
    %c0_i32_0 = arith.constant 0 : i32
    %c0_i32_1 = arith.constant 0 : i32
    return %c0_i32, %c0_i32_0 : i32, i32
  }
  func.func @transform_2(%arg0: i32) -> (i32, i32) {
    %c0_i32 = arith.constant 0 : i32
    %c0_i32_0 = arith.constant 0 : i32
    %c0_i32_1 = arith.constant 0 : i32
    return %c0_i32, %c0_i32_0 : i32, i32
  }
  func.func @transform_3(%arg0: i32) -> (i32, i32) {
    %c0_i32 = arith.constant 0 : i32
    %c0_i32_0 = arith.constant 0 : i32
    %c0_i32_1 = arith.constant 0 : i32
    return %c0_i32, %c0_i32_0 : i32, i32
  }
  func.func @transform_4(%arg0: i32) -> (i32, i32) {
    %c0_i32 = arith.constant 0 : i32
    %c0_i32_0 = arith.constant 0 : i32
    %c0_i32_1 = arith.constant 0 : i32
    return %c0_i32, %c0_i32_0 : i32, i32
  }
  func.func @transform_5(%arg0: i32) -> (i32, i32) {
    %c0_i32 = arith.constant 0 : i32
    %c0_i32_0 = arith.constant 0 : i32
    %c0_i32_1 = arith.constant 0 : i32
    return %c0_i32, %c0_i32_0 : i32, i32
  }
  func.func @transform_6(%arg0: i32) -> (i32, i32) {
    %c0_i32 = arith.constant 0 : i32
    %c0_i32_0 = arith.constant 0 : i32
    %c0_i32_1 = arith.constant 0 : i32
    return %c0_i32, %c0_i32_0 : i32, i32
  }
  func.func @transform_7(%arg0: i32) -> (i32, i32) {
    %c0_i32 = arith.constant 0 : i32
    %c0_i32_0 = arith.constant 0 : i32
    return %arg0, %c0_i32 : i32, i32
  }
}

</mosaic_0001>

<bundles_post_ra>
// kernel: audio_embeddings_forward.1
= control target key start
LH: loop header
LB: loop body
LE: loop exit
PB: predicated region body
PF: predicated region fallthrough
CT: control target
= control target key end

     0   :  { %s1544_s24 = smov 0   ;;  %s1546_s25 = smov 0   ;;  %s1876_s0 = inlined_call_operand.vmem [shape: f32[200,32], index: 0, kind: input, shape index: {}]   ;;  %s1877_s1 = inlined_call_operand.vmem [shape: bf16[32,128], index: 1, kind: input, shape index: {}]   ;;  %s1878_s2 = inlined_call_operand.vmem [shape: f32[1,128], index: 2, kind: input, shape index: {}]   ;;  %s1879_s3 = inlined_call_operand.vmem [shape: bf16[128,128], index: 3, kind: input, shape index: {}]   ;;  %s1880_s4 = inlined_call_operand.vmem [shape: f32[1,128], index: 4, kind: input, shape index: {}]   ;;  %s1881_s5 = inlined_call_operand.vmem [shape: bf16[128,16], index: 5, kind: input, shape index: {}]   ;;  %s1882_s6 = inlined_call_operand.vmem [shape: f32[1,16], index: 6, kind: input, shape index: {}]   ;;  %s1883_s7 = inlined_call_operand.vmem [shape: f32[200,16], index: 7, kind: output, shape index: {}]  }
   0x1   :  { %s1548_s26 = smov 0  }
   0x2 LB: > { %s1557_s27 = sadd.s32 4294967295, %s1468_s26   ;;  %s1559_s28 = sadd.s32 1, %s1468_s26   ;;  %s1468_s26 = sphi %s1548_s26, %s1890_s26   ;;  %s1464_s25 = sphi %s1546_s25, %s1889_s25   ;;  %s1460_s24 = sphi %s1544_s24, %s1888_s24  }
   0x3   : > { %s173_s29 = ssub.s32 %s1468_s26, %s1559_s28  ;;  %s176_s30 = sadd.s32 1, %s1464_s25 }
   0x4   : > { %p174_p0 = scmp.eq.s32.totalorder %s173_s29, 0  ;;  %p186_p1 = scmp.ne.s32.totalorder %s1464_s25, %s1460_s24 }
   0x5   : > { %p187_p2 = scmp.eq.s32.totalorder %s1557_s27, 1  ;;  %p1094_p3 = scmp.ge.s32.totalorder %s1468_s26, 1 }
   0x6   : > { %s1567_s8 = scalar_select %p174_p0, %s1464_s25, %s176_s30  }
   0x7   : > { %p1569_p4 = por %p187_p2, %p186_p1  ;;  %p246_p5 = scmp.lt.s32.totalorder %s1468_s26, 3 }
   0x9   : > { %p247_p6 = pnand %p1094_p3, %p246_p5 }
   0xa   : > { %v1392_v0 = vld [vmem:[%s1877_s1] sm:$0xff] (!%p247_p6)   ;;  %v1502_v1 = vmov (!%p247_p6), 0.0   ;;  %v1393_v2 = vld [vmem:[%s1877_s1 + $0x8] sm:$0xff] (!%p247_p6)   ;;  %vm1503_vm0 = vmmov (!%p247_p6), 0   ;;  %s1584_s14 = smul.u32 (!%p247_p6), 13, %s1557_s27  ;;  %vm344_vm1 = vcmask (!%p247_p6), 261120  }
   0xb   : > { %250 = sbr.rel (%p247_p6) target bundleno = 789 (0x315), region = 48  ;;  %1176 = vmatprep.subr.bf16.mxu0 (!%p247_p6), %v1502_v1  ;;  %1296 = vmatprep.subr.bf16.mxu1 (!%p247_p6), %v1502_v1  ;;  %v1394_v9 = vld [vmem:[%s1879_s3] sm:$0xff] (!%p247_p6)   ;;  %v1395_v14 = vld [vmem:[%s1879_s3 + $0x8] sm:$0xff] (!%p247_p6)   ;;  %v1396_v17 = vld [vmem:[%s1879_s3 + $0x10] sm:$0xff] (!%p247_p6)   ;;  %s278_s26 = sand.u32 (!%p247_p6), 1, %s1460_s24   ;;  %vm812_vm2 = vcmask (!%p247_p6), 130048  }
   0xc   : > { %1177 = vmatpush3.bf16.msra.mxu0 (!%p247_p6), %v1392_v0  ;;  %1180 = vmatprep.mubr.msk.bf16.mxu0 (!%p247_p6), %vm1503_vm0, %v1502_v1  ;;  %p286_p7 = scmp.lt.s32.totalorder (!%p247_p6), %s1584_s14, 24  ;;  %v1397_v22 = vld [vmem:[%s1879_s3 + $0x18] sm:$0xff] (!%p247_p6)   ;;  %v1398_v24 = vld [vmem:[%s1879_s3 + $0x20] sm:$0xff] (!%p247_p6)   ;;  %v1399_v28 = vld [vmem:[%s1879_s3 + $0x28] sm:$0xff] (!%p247_p6)   ;;  %s1300_s29 = smul.u32 (!%p247_p6), 104, %s278_s26 }
   0xd   : > { %1178 = vmatprep.subr.bf16.mxu0 (!%p247_p6), %v1502_v1  ;;  %1298 = vmatpush3.bf16.msra.mxu1 (!%p247_p6), %v1392_v0  ;;  %v1400_v29 = vld [vmem:[%s1879_s3 + $0x30] sm:$0xff] (!%p247_p6)   ;;  %v1401_v30 = vld [vmem:[%s1879_s3 + $0x38] sm:$0xff] (!%p247_p6)   ;;  %v1402_v31 = vld [vmem:[%s1881_s5] sm:$0xff] (!%p247_p6)  }
   0xe   : > { %1297 = vmatprep.subr.bf16.mxu1 (!%p247_p6), %v1502_v1  ;;  %1196 = vmatprep.mubr.msk.bf16.mxu1 (!%p247_p6), %vm1503_vm0, %v1502_v1  ;;  %v1403_v32 = vld [vmem:[%s1881_s5 + $0x8] sm:$0xff] (!%p247_p6)   ;;  %v1404_v33 = vld [vmem:[%s1881_s5 + $0x10] sm:$0xff] (!%p247_p6)   ;;  %v1405_v34 = vld [vmem:[%s1881_s5 + $0x18] sm:$0xff] (!%p247_p6)   ;;  %s1759_s11 = scalar_lea.vmem (!%p247_p6), [#allocation2], %s1300_s29  }
   0xf   : > { %v1406_v35 = vld [vmem:[%s1881_s5 + $0x20] sm:$0xff] (!%p247_p6)   ;;  %v1407_v36 = vld [vmem:[%s1881_s5 + $0x28] sm:$0xff] (!%p247_p6)  }
  0x10   : > { %1179 = vmatpush3.bf16.msra.mxu0 (!%p247_p6), %v1393_v2  ;;  %v1691_v37 = vld [vmem:[%s1878_s2] ss:$0 sm:$0xff] (!%p247_p6) }
  0x11   : > { %1299 = vmatpush3.bf16.msra.mxu1 (!%p247_p6), %v1393_v2  ;;  %1252 = vmatprep.subr.bf16.mxu0 (!%p247_p6), %v1502_v1 }
  0x12   : > { %s287_s15 = scalar_select %p286_p7, %s1584_s14, 24  ;;  %1208 = vmatprep.subr.bf16.mxu1 %v1502_v1 }
  0x13   : > { %s834_s24 = ssub.s32 (%p1569_p4), 25, %s1584_s14  ;;  %s1136_s12 = smul.u32 (%p1569_p4), 104, %s1557_s27 }
  0x14   : > { %s1095_s16 = sshll.u32 %s287_s15, 3  ;;  %p835_p8 = scmp.lt.s32.totalorder (%p1569_p4), %s834_s24, 13 }
  0x15   : > { %s1597_s19 = scalar_lea.vmem %s1876_s0, %s1095_s16  ;;  %s1794_s16 = scalar_lea.vmem (%p1569_p4), %s1883_s7, %s1136_s12  }
  0x16   : > { %v301_v3 = vld [vmem:[%s1597_s19] sm:$0xff]  ;;  %v302_v4 = vld [vmem:[%s1597_s19 + $0x8] sm:$0xff]  ;;  %v303_v7 = vld [vmem:[%s1597_s19 + $0x10] sm:$0xff] }
  0x17   : > { %v314_v5 = vpack.c.bf16 %v302_v4, %v301_v3  ;;  %v309_v6 = vld [vmem:[%s1597_s19 + $0x40] sm:$0xff]  ;;  %v310_v8 = vld [vmem:[%s1597_s19 + $0x48] sm:$0xff]  ;;  %v304_v10 = vld [vmem:[%s1597_s19 + $0x18] sm:$0xff] }
  0x18   : > { %v318_v11 = vpack.c.bf16 %v310_v8, %v309_v6  ;;  %v311_v12 = vld [vmem:[%s1597_s19 + $0x50] sm:$0xff]  ;;  %v312_v13 = vld [vmem:[%s1597_s19 + $0x58] sm:$0xff]  ;;  %v315_v15 = vpack.c.bf16 %v304_v10, %v303_v7  ;;  %v305_v18 = vld [vmem:[%s1597_s19 + $0x20] sm:$0xff] }
  0x19   : > { %1181 = vmatmul.mubr.msk.bf16.vlgmr.msra.gmra.mrb[0].mxu0 %vm344_vm1, %v314_v5  ;;  %v319_v16 = vpack.c.bf16 %v312_v13, %v311_v12  ;;  %v306_v19 = vld [vmem:[%s1597_s19 + $0x28] sm:$0xff]  ;;  %v313_v21 = vld [vmem:[%s1597_s19 + $0x60] sm:$0xff]  ;;  %v307_v25 = vld [vmem:[%s1597_s19 + $0x30] sm:$0xff] }
  0x1a   : > { %1184 = vmatprep.mubr.msk.bf16.mxu0 %vm1503_vm0, %v1502_v1  ;;  %1197 = vmatmul.mubr.msk.bf16.vlgmr.msra.gmra.mrb[0].mxu1 %vm344_vm1, %v318_v11  ;;  %v316_v20 = vpack.c.bf16 %v306_v19, %v305_v18  ;;  %v320_v23 = vpack.c.bf16 %v313_v21, %v313_v21  ;;  %v308_v26 = vld [vmem:[%s1597_s19 + $0x38] sm:$0xff] }
  0x1b   : > { %1200 = vmatprep.mubr.msk.bf16.mxu1 %vm1503_vm0, %v1502_v1  ;;  %1209 = vmatpush3.bf16.msra.mxu1 %v1394_v9  ;;  %v317_v27 = vpack.c.bf16 %v308_v26, %v307_v25 }
  0x1c   : > { %1210 = vmatprep.subr.bf16.mxu1 %v1502_v1  ;;  %1253 = vmatpush3.bf16.msra.mxu0 %v1402_v31 }
  0x1d   : > { %1254 = vmatprep.subr.bf16.mxu0 %v1502_v1 }
  0x1f   : > { %1211 = vmatpush3.bf16.msra.mxu1 %v1395_v14 }
  0x20   : > { %1212 = vmatprep.subr.bf16.mxu1 %v1502_v1  ;;  %1255 = vmatpush3.bf16.msra.mxu0 %v1403_v32 }
  0x21   : > { %1185 = vmatmul.mubr.msk.bf16.gmra.mrb[4].mxu0 %vm344_vm1, %v315_v15  ;;  %1256 = vmatprep.subr.bf16.mxu0 %v1502_v1 }
  0x22   : > { %1188 = vmatprep.mubr.msk.bf16.mxu0 %vm1503_vm0, %v1502_v1  ;;  %1201 = vmatmul.mubr.msk.bf16.gmra.mrb[4].mxu1 %vm344_vm1, %v319_v16 }
  0x23   : > { %1204 = vmatprep.mubr.msk.bf16.mxu1 %vm1503_vm0, %v1502_v1  ;;  %1213 = vmatpush3.bf16.msra.mxu1 %v1396_v17 }
  0x24   : > { %1214 = vmatprep.subr.bf16.mxu1 %v1502_v1  ;;  %1257 = vmatpush3.bf16.msra.mxu0 %v1404_v33 }
  0x25   : > { %1258 = vmatprep.subr.bf16.mxu0 %v1502_v1 }
  0x27   : > { %1215 = vmatpush3.bf16.msra.mxu1 %v1397_v22 }
  0x28   : > { %1216 = vmatprep.subr.bf16.mxu1 %v1502_v1  ;;  %1259 = vmatpush3.bf16.msra.mxu0 %v1405_v34 }
  0x29   : > { %1189 = vmatmul.mubr.msk.bf16.gmra.mrb[8].mxu0 %vm344_vm1, %v316_v20  ;;  %1260 = vmatprep.subr.bf16.mxu0 %v1502_v1 }
  0x2a   : > { %1192 = vmatprep.mubr.msk.bf16.mxu0 %vm1503_vm0, %v1502_v1  ;;  %1205 = vmatmul.mubr.msk.bf16.gmra.mrb[8].mxu1 %vm344_vm1, %v320_v23 }
  0x2b   : > { %1217 = vmatpush3.bf16.msra.mxu1 %v1398_v24  ;;  %1224 = vmatprep.mubr.msk.bf16.mxu1 %vm1503_vm0, %v1502_v1 }
  0x2c   : > { %1218 = vmatprep.subr.bf16.mxu1 %v1502_v1  ;;  %1261 = vmatpush3.bf16.msra.mxu0 %v1406_v35 }
  0x2d   : > { %1262 = vmatprep.subr.bf16.mxu0 %v1502_v1 }
  0x2f   : > { %1219 = vmatpush3.bf16.msra.mxu1 %v1399_v28 }
  0x30   : > { %1220 = vmatprep.subr.bf16.mxu1 %v1502_v1  ;;  %1263 = vmatpush3.bf16.msra.mxu0 %v1407_v36  ;;  %v1408_v36 = vld [vmem:[%s1881_s5 + $0x30] sm:$0xff]  }
  0x31   : > { %1193 = vmatmul.mubr.msk.bf16.gmra.mrb[12].mxu0 %vm344_vm1, %v317_v27  ;;  %1264 = vmatprep.subr.bf16.mxu0 %v1502_v1 }
  0x32   : > { %1268 = vmatprep.mubr.msk.bf16.mxu0 %vm1503_vm0, %v1502_v1 }
  0x33   : > { %1221 = vmatpush3.bf16.msra.mxu1 %v1400_v29 }
  0x34   : > { %1222 = vmatprep.subr.bf16.mxu1 %v1502_v1  ;;  %1265 = vmatpush3.bf16.msra.mxu0 %v1408_v36 }
  0x35   : > { %1266 = vmatprep.subr.bf16.mxu0 %v1502_v1 }
  0x37   : > { %1223 = vmatpush3.bf16.msra.mxu1 %v1401_v30 }
  0xec   : > { %v400_v38 = vpop.f32.mrb[0].mxu0 }
  0xed   : > { %v401_v39 = vadd.f32 %v1691_v37, %v400_v38  ;;  %v1182_v40 = vpop.f32.mrb[1].mxu0  ;;  %v432_v44 = vpop.f32.mrb[0].mxu1  ;;  %v1409_v38 = vld [vmem:[%s1881_s5 + $0x38] sm:$0xff]  }
  0xee   : > { %v403_v41 = vpop.f32.mrb[2].mxu0  ;;  %v433_v45 = vadd.f32 %v1691_v37, %v432_v44  ;;  %v1198_v46 = vpop.f32.mrb[1].mxu1  ;;  %1267 = vmatpush3.bf16.msra.mxu0 %v1409_v38  ;;  %v1115_v38 = vld [vmem:[%s1882_s6] ss:$0 sm:$0xff] }
  0xef   : > { %v404_v42 = vadd.f32 %v1691_v37, %v403_v41  ;;  %v1183_v43 = vpop.f32.mrb[3].mxu0  ;;  %v454_v47 = vmax.f32 %v401_v39, 0.0  ;;  %v435_v49 = vpop.f32.mrb[2].mxu1 }
  0xf0   : > { %v462_v50 = vmax.f32 %v433_v45, 0.0  ;;  %v436_v51 = vadd.f32 %v1691_v37, %v435_v49  ;;  %v1199_v52 = vpop.f32.mrb[3].mxu1 }
  0xf1   : > { %v455_v48 = vmax.f32 %v404_v42, 0.0 }
  0xf2   : > { %v463_v55 = vmax.f32 %v436_v51, 0.0 }
  0xf3   : > { %v467_v53 = vpack.c.bf16 %v455_v48, %v454_v47 }
  0xf4   : > { %v408_v54 = vpop.f32.mrb[4].mxu0  ;;  %v471_v59 = vpack.c.bf16 %v463_v55, %v462_v50 }
  0xf5   : > { %v409_v56 = vadd.f32 %v1691_v37, %v408_v54  ;;  %v1186_v57 = vpop.f32.mrb[5].mxu0  ;;  %1225 = vmatmul.mubr.bf16.vlgmr.msra.gmra.mrb[12].mxu1 %v467_v53  ;;  %v440_v62 = vpop.f32.mrb[4].mxu1 }
  0xf6   : > { %v411_v58 = vpop.f32.mrb[6].mxu0  ;;  %1228 = vmatprep.mubr.msk.bf16.mxu1 %vm1503_vm0, %v1502_v1  ;;  %v441_v63 = vadd.f32 %v1691_v37, %v440_v62  ;;  %v1202_v0 = vpop.f32.mrb[5].mxu1 }
  0xf7   : > { %v412_v60 = vadd.f32 %v1691_v37, %v411_v58  ;;  %v1187_v61 = vpop.f32.mrb[7].mxu0  ;;  %v456_v2 = vmax.f32 %v409_v56, 0.0  ;;  %v443_v4 = vpop.f32.mrb[6].mxu1 }
  0xf8   : > { %v464_v5 = vmax.f32 %v441_v63, 0.0  ;;  %v444_v6 = vadd.f32 %v1691_v37, %v443_v4  ;;  %v1203_v7 = vpop.f32.mrb[7].mxu1 }
  0xf9   : > { %v457_v3 = vmax.f32 %v412_v60, 0.0 }
  0xfa   : > { %v465_v10 = vmax.f32 %v444_v6, 0.0 }
  0xfb   : > { %v468_v8 = vpack.c.bf16 %v457_v3, %v456_v2 }
  0xfc   : > { %v416_v9 = vpop.f32.mrb[8].mxu0  ;;  %v472_v14 = vpack.c.bf16 %v465_v10, %v464_v5 }
  0xfd   : > { %v417_v11 = vadd.f32 %v1691_v37, %v416_v9  ;;  %v1190_v12 = vpop.f32.mrb[9].mxu0  ;;  %1229 = vmatmul.mubr.bf16.gmra.mrb[16].mxu1 %v468_v8  ;;  %v448_v17 = vpop.f32.mrb[8].mxu1 }
  0xfe   : > { %v419_v13 = vpop.f32.mrb[10].mxu0  ;;  %1232 = vmatprep.mubr.msk.bf16.mxu1 %vm1503_vm0, %v1502_v1  ;;  %v1206_v18 = vpop.f32.mrb[9].mxu1  ;;  %v449_v33 = vadd.f32 %v1691_v37, %v448_v17 }
  0xff   : > { %v420_v15 = vadd.f32 %v1691_v37, %v419_v13  ;;  %v1191_v16 = vpop.f32.mrb[11].mxu0  ;;  %v458_v19 = vmax.f32 %v417_v11, 0.0  ;;  %v451_v21 = vpop.f32.mrb[10].mxu1 }
 0x100   : > { %v1207_v22 = vpop.f32.mrb[11].mxu1  ;;  %v466_v34 = vmax.f32 %v449_v33, 0.0 }
 0x101   : > { %v459_v20 = vmax.f32 %v420_v15, 0.0 }
 0x102   : > { %v473_v35 = vpack.c.bf16 %v466_v34, %v466_v34 }
 0x103   : > { %v469_v23 = vpack.c.bf16 %v459_v20, %v458_v19 }
 0x104   : > { %v424_v24 = vpop.f32.mrb[12].mxu0 }
 0x105   : > { %v425_v25 = vadd.f32 %v1691_v37, %v424_v24  ;;  %v1194_v26 = vpop.f32.mrb[13].mxu0  ;;  %1233 = vmatmul.mubr.bf16.gmra.mrb[20].mxu1 %v469_v23 }
 0x106   : > { %v427_v27 = vpop.f32.mrb[14].mxu0  ;;  %1236 = vmatprep.mubr.msk.bf16.mxu1 %vm1503_vm0, %v1502_v1 }
 0x107   : > { %v428_v28 = vadd.f32 %v1691_v37, %v427_v27  ;;  %v1195_v29 = vpop.f32.mrb[15].mxu0  ;;  %v460_v30 = vmax.f32 %v425_v25, 0.0  ;;  %v1728_v37 = vld [vmem:[%s1880_s4] ss:$0 sm:$0xff] }
 0x109   : > { %v461_v31 = vmax.f32 %v428_v28, 0.0 }
 0x10b   : > { %v470_v32 = vpack.c.bf16 %v461_v31, %v460_v30 }
 0x10d   : > { %1237 = vmatmul.mubr.bf16.gmra.mrb[24].mxu1 %v470_v32 }
 0x10e   : > { %1240 = vmatprep.mubr.msk.bf16.mxu1 %vm1503_vm0, %v1502_v1 }
 0x115   : > { %1241 = vmatmul.mubr.bf16.gmra.mrb[28].mxu1 %v471_v59 }
 0x116   : > { %1244 = vmatprep.mubr.msk.bf16.mxu1 %vm1503_vm0, %v1502_v1 }
 0x11d   : > { %1245 = vmatmul.mubr.bf16.gmra.mrb[32].mxu1 %v472_v14 }
 0x11e   : > { %1248 = vmatprep.mubr.msk.bf16.mxu1 %vm1503_vm0, %v1502_v1 }
 0x125   : > { %1249 = vmatmul.mubr.bf16.gmra.mrb[36].mxu1 %v473_v35 }
 0x1c8   : > { %v579_v39 = vpop.f32.mrb[12].mxu1 }
 0x1c9   : > { %v580_v40 = vadd.f32 %v1728_v37, %v579_v39  ;;  %v1226_v41 = vpop.f32.mrb[13].mxu1 }
 0x1ca   : > { %v582_v42 = vpop.f32.mrb[14].mxu1 }
 0x1cb   : > { %v583_v43 = vadd.f32 %v1728_v37, %v582_v42  ;;  %v1227_v44 = vpop.f32.mrb[15].mxu1  ;;  %v633_v45 = vmax.f32 %v580_v40, 0.0 }
 0x1cd   : > { %v634_v46 = vmax.f32 %v583_v43, 0.0 }
 0x1cf   : > { %v646_v47 = vpack.c.bf16 %v634_v46, %v633_v45 }
 0x1d0   : > { %v587_v48 = vpop.f32.mrb[16].mxu1 }
 0x1d1   : > { %v588_v49 = vadd.f32 %v1728_v37, %v587_v48  ;;  %v1230_v50 = vpop.f32.mrb[17].mxu1  ;;  %1269 = vmatmul.mubr.bf16.vlgmr.msra.gmra.mrb[16].mxu0 %v646_v47 }
 0x1d2   : > { %v590_v51 = vpop.f32.mrb[18].mxu1  ;;  %1272 = vmatprep.mubr.msk.bf16.mxu0 %vm1503_vm0, %v1502_v1 }
 0x1d3   : > { %v591_v52 = vadd.f32 %v1728_v37, %v590_v51  ;;  %v1231_v53 = vpop.f32.mrb[19].mxu1  ;;  %v635_v54 = vmax.f32 %v588_v49, 0.0 }
 0x1d5   : > { %v636_v55 = vmax.f32 %v591_v52, 0.0 }
 0x1d7   : > { %v647_v56 = vpack.c.bf16 %v636_v55, %v635_v54 }
 0x1d8   : > { %v595_v57 = vpop.f32.mrb[20].mxu1 }
 0x1d9   : > { %v596_v58 = vadd.f32 %v1728_v37, %v595_v57  ;;  %v1234_v59 = vpop.f32.mrb[21].mxu1  ;;  %1273 = vmatmul.mubr.bf16.gmra.mrb[20].mxu0 %v647_v56 }
 0x1da   : > { %v598_v60 = vpop.f32.mrb[22].mxu1  ;;  %1276 = vmatprep.mubr.msk.bf16.mxu0 %vm1503_vm0, %v1502_v1 }
 0x1db   : > { %v599_v61 = vadd.f32 %v1728_v37, %v598_v60  ;;  %v1235_v62 = vpop.f32.mrb[23].mxu1  ;;  %v637_v63 = vmax.f32 %v596_v58, 0.0 }
 0x1dd   : > { %v638_v0 = vmax.f32 %v599_v61, 0.0 }
 0x1df   : > { %v648_v2 = vpack.c.bf16 %v638_v0, %v637_v63 }
 0x1e0   : > { %v603_v3 = vpop.f32.mrb[24].mxu1 }
 0x1e1   : > { %v604_v4 = vadd.f32 %v1728_v37, %v603_v3  ;;  %v1238_v5 = vpop.f32.mrb[25].mxu1  ;;  %1277 = vmatmul.mubr.bf16.gmra.mrb[24].mxu0 %v648_v2 }
 0x1e2   : > { %v606_v6 = vpop.f32.mrb[26].mxu1  ;;  %1280 = vmatprep.mubr.msk.bf16.mxu0 %vm1503_vm0, %v1502_v1 }
 0x1e3   : > { %v607_v7 = vadd.f32 %v1728_v37, %v606_v6  ;;  %v1239_v8 = vpop.f32.mrb[27].mxu1  ;;  %v639_v9 = vmax.f32 %v604_v4, 0.0 }
 0x1e5   : > { %v640_v10 = vmax.f32 %v607_v7, 0.0 }
 0x1e7   : > { %v649_v11 = vpack.c.bf16 %v640_v10, %v639_v9 }
 0x1e8   : > { %v611_v12 = vpop.f32.mrb[28].mxu1 }
 0x1e9   : > { %v612_v13 = vadd.f32 %v1728_v37, %v611_v12  ;;  %v1242_v14 = vpop.f32.mrb[29].mxu1  ;;  %1281 = vmatmul.mubr.bf16.gmra.mrb[28].mxu0 %v649_v11 }
 0x1ea   : > { %v614_v15 = vpop.f32.mrb[30].mxu1  ;;  %1284 = vmatprep.mubr.msk.bf16.mxu0 %vm1503_vm0, %v1502_v1 }
 0x1eb   : > { %v615_v16 = vadd.f32 %v1728_v37, %v614_v15  ;;  %v1243_v17 = vpop.f32.mrb[31].mxu1  ;;  %v641_v18 = vmax.f32 %v612_v13, 0.0 }
 0x1ed   : > { %v642_v19 = vmax.f32 %v615_v16, 0.0 }
 0x1ef   : > { %v650_v20 = vpack.c.bf16 %v642_v19, %v641_v18 }
 0x1f0   : > { %v619_v21 = vpop.f32.mrb[32].mxu1 }
 0x1f1   : > { %v620_v22 = vadd.f32 %v1728_v37, %v619_v21  ;;  %v1246_v23 = vpop.f32.mrb[33].mxu1  ;;  %1285 = vmatmul.mubr.bf16.gmra.mrb[32].mxu0 %v650_v20 }
 0x1f2   : > { %v622_v24 = vpop.f32.mrb[34].mxu1  ;;  %1288 = vmatprep.mubr.msk.bf16.mxu0 %vm1503_vm0, %v1502_v1 }
 0x1f3   : > { %v623_v25 = vadd.f32 %v1728_v37, %v622_v24  ;;  %v1247_v26 = vpop.f32.mrb[35].mxu1  ;;  %v643_v27 = vmax.f32 %v620_v22, 0.0 }
 0x1f5   : > { %v644_v28 = vmax.f32 %v623_v25, 0.0 }
 0x1f7   : > { %v651_v29 = vpack.c.bf16 %v644_v28, %v643_v27 }
 0x1f8   : > { %v627_v30 = vpop.f32.mrb[36].mxu1 }
 0x1f9   : > { %v628_v31 = vadd.f32 %v1728_v37, %v627_v30  ;;  %v1250_v32 = vpop.f32.mrb[37].mxu1  ;;  %1289 = vmatmul.mubr.bf16.gmra.mrb[36].mxu0 %v651_v29 }
 0x1fa   : > { %v630_v33 = vpop.f32.mrb[38].mxu1  ;;  %1292 = vmatprep.mubr.msk.bf16.mxu0 %vm1503_vm0, %v1502_v1 }
 0x1fb   : > { %v645_v34 = vmax.f32 %v628_v31, 0.0  ;;  %v1251_v35 = vpop.f32.mrb[39].mxu1 }
 0x1fd   : > { %v652_v36 = vpack.c.bf16 %v645_v34, %v645_v34 }
 0x201   : > { %1293 = vmatmul.mubr.bf16.gmra.mrb[40].mxu0 %v652_v36 }
 0x2a4   : > { %v758_v39 = vpop.f32.mrb[16].mxu0 }
 0x2a5   : > { %v759_v40 = vadd.f32 %v1115_v38, %v758_v39  ;;  %v1270_v37 = vpop.f32.mrb[17].mxu0 }
 0x2a6   : > { %v761_v41 = vpop.f32.mrb[18].mxu0 }
 0x2a7   : > { %813 = vst.msk [vmem:[%s1759_s11] sm:$0xff] %vm812_vm2, %v759_v40  ;;  %v762_v1 = vadd.f32 %v1115_v38, %v761_v41  ;;  %v1271_v42 = vpop.f32.mrb[19].mxu0 }
 0x2a9   : > { %814 = vst.msk [vmem:[%s1759_s11 + $0x8] sm:$0xff] %vm812_vm2, %v762_v1 }
 0x2ac   : > { %v766_v43 = vpop.f32.mrb[20].mxu0 }
 0x2ad   : > { %v767_v44 = vadd.f32 %v1115_v38, %v766_v43  ;;  %v1274_v45 = vpop.f32.mrb[21].mxu0 }
 0x2ae   : > { %v769_v46 = vpop.f32.mrb[22].mxu0 }
 0x2af   : > { %815 = vst.msk [vmem:[%s1759_s11 + $0x10] sm:$0xff] %vm812_vm2, %v767_v44  ;;  %v770_v47 = vadd.f32 %v1115_v38, %v769_v46  ;;  %v1275_v48 = vpop.f32.mrb[23].mxu0 }
 0x2b1   : > { %816 = vst.msk [vmem:[%s1759_s11 + $0x18] sm:$0xff] %vm812_vm2, %v770_v47 }
 0x2b4   : > { %v774_v49 = vpop.f32.mrb[24].mxu0 }
 0x2b5   : > { %v775_v50 = vadd.f32 %v1115_v38, %v774_v49  ;;  %v1278_v51 = vpop.f32.mrb[25].mxu0 }
 0x2b6   : > { %v777_v52 = vpop.f32.mrb[26].mxu0 }
 0x2b7   : > { %817 = vst.msk [vmem:[%s1759_s11 + $0x20] sm:$0xff] %vm812_vm2, %v775_v50  ;;  %v778_v53 = vadd.f32 %v1115_v38, %v777_v52  ;;  %v1279_v54 = vpop.f32.mrb[27].mxu0 }
 0x2b9   : > { %818 = vst.msk [vmem:[%s1759_s11 + $0x28] sm:$0xff] %vm812_vm2, %v778_v53 }
 0x2bc   : > { %v782_v55 = vpop.f32.mrb[28].mxu0 }
 0x2bd   : > { %v783_v56 = vadd.f32 %v1115_v38, %v782_v55  ;;  %v1282_v57 = vpop.f32.mrb[29].mxu0 }
 0x2be   : > { %v785_v58 = vpop.f32.mrb[30].mxu0 }
 0x2bf   : > { %819 = vst.msk [vmem:[%s1759_s11 + $0x30] sm:$0xff] %vm812_vm2, %v783_v56  ;;  %v786_v59 = vadd.f32 %v1115_v38, %v785_v58  ;;  %v1283_v60 = vpop.f32.mrb[31].mxu0 }
 0x2c1   : > { %820 = vst.msk [vmem:[%s1759_s11 + $0x38] sm:$0xff] %vm812_vm2, %v786_v59 }
 0x2c4   : > { %v790_v61 = vpop.f32.mrb[32].mxu0 }
 0x2c5   : > { %v791_v62 = vadd.f32 %v1115_v38, %v790_v61  ;;  %v1286_v63 = vpop.f32.mrb[33].mxu0 }
 0x2c6   : > { %v793_v0 = vpop.f32.mrb[34].mxu0 }
 0x2c7   : > { %821 = vst.msk [vmem:[%s1759_s11 + $0x40] sm:$0xff] %vm812_vm2, %v791_v62  ;;  %v794_v2 = vadd.f32 %v1115_v38, %v793_v0  ;;  %v1287_v3 = vpop.f32.mrb[35].mxu0 }
 0x2c9   : > { %822 = vst.msk [vmem:[%s1759_s11 + $0x48] sm:$0xff] %vm812_vm2, %v794_v2 }
 0x2cc   : > { %v798_v4 = vpop.f32.mrb[36].mxu0 }
 0x2cd   : > { %v799_v5 = vadd.f32 %v1115_v38, %v798_v4  ;;  %v1290_v6 = vpop.f32.mrb[37].mxu0 }
 0x2ce   : > { %v801_v7 = vpop.f32.mrb[38].mxu0 }
 0x2cf   : > { %823 = vst.msk [vmem:[%s1759_s11 + $0x50] sm:$0xff] %vm812_vm2, %v799_v5  ;;  %v802_v8 = vadd.f32 %v1115_v38, %v801_v7  ;;  %v1291_v9 = vpop.f32.mrb[39].mxu0 }
 0x2d1   : > { %824 = vst.msk [vmem:[%s1759_s11 + $0x58] sm:$0xff] %vm812_vm2, %v802_v8  ;;  %832 = sbr.rel (!%p1569_p4) target bundleno = 789 (0x315), region = 52 }
 0x2d4   : > { %v806_v10 = vpop.f32.mrb[40].mxu0 }
 0x2d5   : > { %v807_v11 = vadd.f32 %v1115_v38, %v806_v10  ;;  %v1294_v12 = vpop.f32.mrb[41].mxu0 }
 0x2d6   : > { %v809_v13 = vpop.f32.mrb[42].mxu0 }
 0x2d7   : > { %825 = vst.msk [vmem:[%s1759_s11 + $0x60] sm:$0xff] %vm812_vm2, %v807_v11  ;;  %v1295_v14 = vpop.f32.mrb[43].mxu0 }
 0x2d8   : > { %s1892_s24 = smov (!%p835_p8, %s834_s24), 13 }
 0x2d9   : > { %s1124_s17 = sshll.u32 %s1892_s24, 7 }
 0x2da   : > { %p1127_p9 = scmp.eq.s32.totalorder %s1124_s17, 0 }
 0x2db   : > { %1410 = sdivrem.u32 (!%p1127_p9), %s1892_s24, 13 }
 0x2dc   : > { %843 = sbr.rel (%p1127_p9) target bundleno = 789 (0x315), region = 56 }
 0x2e4   : > { %s1800_s9 = spop.drf %1410 }
 0x2e5   : > { %p1128_p10 = scmp.le.s32.totalorder %s1800_s9, 0 }
 0x2e6   : > { %s1885_s27 = smov (!%p1128_p10), %s1794_s16  ;;  %s1886_s14 = smov (!%p1128_p10), %s1759_s11 }
 0x2e7   : > { %1047 = sbr.rel (%p1128_p10) target bundleno = 760 (0x2f8), region = 132  ;;  %s1809_s18 = smov (!%p1128_p10), 0  }
 0x2e8   : > { %s1811_s19 = smov (!%p1128_p10), 0  }
 0x2ee LB: >> { %v931_v15 = vld [vmem:[%s1476_s14] sm:$0xff]  ;;  %v933_v16 = vld [vmem:[%s1476_s14 + $0x8] sm:$0xff]  ;;  %v935_v17 = vld [vmem:[%s1476_s14 + $0x10] sm:$0xff]  ;;  %s957_s20 = sadd.s32 1, %s1480_s18  ;;  %s925_s19 = sadd.s32 1, %s1484_s19   ;;  %s1484_s19 = sphi %s1811_s19, %s925_s19   ;;  %s1480_s18 = sphi %s1809_s18, %s1887_s18   ;;  %s1476_s14 = sphi %s1886_s14, %s962_s14   ;;  %s1472_s27 = sphi %s1885_s27, %s963_s27  }
 0x2ef   : >> { %932 = vst [vmem:[%s1472_s27] sm:$0xff] %v931_v15  ;;  %934 = vst [vmem:[%s1472_s27 + $0x8] sm:$0xff] %v933_v16  ;;  %v937_v18 = vld [vmem:[%s1476_s14 + $0x18] sm:$0xff]  ;;  %v939_v19 = vld [vmem:[%s1476_s14 + $0x20] sm:$0xff]  ;;  %p958_p11 = scmp.ge.s32.totalorder %s957_s20, %s1800_s9  ;;  %p924_p12 = scmp.ge.s32.totalorder %s925_s19, %s1800_s9 }
 0x2f0   : >> { %936 = vst [vmem:[%s1472_s27 + $0x10] sm:$0xff] %v935_v17  ;;  %v941_v20 = vld [vmem:[%s1476_s14 + $0x28] sm:$0xff]  ;;  %938 = vst [vmem:[%s1472_s27 + $0x18] sm:$0xff] %v937_v18  ;;  %v943_v21 = vld [vmem:[%s1476_s14 + $0x30] sm:$0xff] }
 0x2f1   : >> { %940 = vst [vmem:[%s1472_s27 + $0x20] sm:$0xff] %v939_v19  ;;  %942 = vst [vmem:[%s1472_s27 + $0x28] sm:$0xff] %v941_v20  ;;  %v945_v22 = vld [vmem:[%s1476_s14 + $0x38] sm:$0xff]  ;;  %v947_v23 = vld [vmem:[%s1476_s14 + $0x40] sm:$0xff]  ;;  %s1894_s20 = smov (%p958_p11, %s957_s20), 0  ;;  %927 = sbr.rel (!%p924_p12) target bundleno = 750 (0x2ee), region = 138 }
 0x2f2   : >> { %944 = vst [vmem:[%s1472_s27 + $0x30] sm:$0xff] %v943_v21  ;;  %946 = vst [vmem:[%s1472_s27 + $0x38] sm:$0xff] %v945_v22  ;;  %v949_v24 = vld [vmem:[%s1476_s14 + $0x48] sm:$0xff]  ;;  %v951_v25 = vld [vmem:[%s1476_s14 + $0x50] sm:$0xff]  ;;  %s960_s21 = smul.u32 104, %s1894_s20  ;;  %s1887_s18 = smov %s1894_s20 }
 0x2f3   : >> { %948 = vst [vmem:[%s1472_s27 + $0x40] sm:$0xff] %v947_v23  ;;  %v953_v26 = vld [vmem:[%s1476_s14 + $0x58] sm:$0xff]  ;;  %950 = vst [vmem:[%s1472_s27 + $0x48] sm:$0xff] %v949_v24  ;;  %v955_v27 = vld [vmem:[%s1476_s14 + $0x60] sm:$0xff] }
 0x2f4   : >> { %952 = vst [vmem:[%s1472_s27 + $0x50] sm:$0xff] %v951_v25  ;;  %954 = vst [vmem:[%s1472_s27 + $0x58] sm:$0xff] %v953_v26  ;;  %s962_s14 = scalar_lea.vmem %s1759_s11, %s960_s21 [#allocation2]  }
 0x2f5   : >> { %956 = vst [vmem:[%s1472_s27 + $0x60] sm:$0xff] %v955_v27  ;;  %s963_s27 = scalar_lea.vmem %s1794_s16, %s960_s21  }
 0x2f8 PF: > { %1412 = sdivrem.u32 %s1892_s24, 13 }
 0x2f9   : > { %s1129_s22 = smul.u32 104, %s1800_s9 }
 0x2fb   : > { %s968_s23 = scalar_lea.vmem %s1759_s11, %s1129_s22 [#allocation2]   ;;  %s970_s26 = scalar_lea.vmem %s1794_s16, %s1129_s22  }
 0x301   : > { %s1413_s29 = spop.drf %1412 }
 0x302   : > { %p1131_p13 = scmp.le.s32.totalorder %s1413_s29, 0 }
 0x303   : > { %s1486_s30 = smov (!%p1131_p13), %s970_s26   ;;  %s1490_s10 = smov (!%p1131_p13), %s968_s23  }
 0x304   : > { %1061 = sbr.rel (%p1131_p13) target bundleno = 789 (0x315), region = 143  ;;  %s1494_s12 = smov (!%p1131_p13), 0  }
 0x305   : > { %s1498_s13 = smov (!%p1131_p13), 0  }
 0x30b LB: >> { %v980_v28 = vld [vmem:[%s1492_s10] sm:$0xff]  ;;  %s982_s15 = sadd.s32 1, %s1496_s12  ;;  %s974_s13 = sadd.s32 1, %s1500_s13   ;;  %s1500_s13 = sphi %s1498_s13, %s974_s13   ;;  %s1496_s12 = sphi %s1494_s12, %s1495_s12   ;;  %s1492_s10 = sphi %s1490_s10, %s987_s10   ;;  %s1488_s30 = sphi %s1486_s30, %s988_s30  }
 0x30c   : >> { %981 = vst [vmem:[%s1488_s30] sm:$0xff] %v980_v28  ;;  %p983_p0 = scmp.ge.s32.totalorder %s982_s15, %s1413_s29  ;;  %p973_p1 = scmp.ge.s32.totalorder %s974_s13, %s1413_s29 }
 0x30e   : >> { %s1896_s15 = smov (%p983_p0, %s982_s15), 0  ;;  %976 = sbr.rel (!%p973_p1) target bundleno = 779 (0x30b), region = 149 }
 0x30f   : >> { %s1132_s11 = sshll.u32 %s1896_s15, 3  ;;  %s1495_s12 = smov %s1896_s15  }
 0x310   : >> { %s987_s10 = scalar_lea.vmem %s968_s23, %s1132_s11 [#allocation2]   ;;  %s988_s30 = scalar_lea.vmem %s970_s26, %s1132_s11  }
 0x315 PF: > { %p14_p2 = scmp.ge.s32.totalorder %s1559_s28, 4   ;;  %s1888_s24 = smov %s1464_s25 }
 0x316   : > { %s1889_s25 = smov %s1567_s8  ;;  %s1890_s26 = smov %s1559_s28 }
 0x317   :  { %16 = sbr.rel (!%p14_p2) target bundleno = 2 (0x2), region = 160 }

</bundles_post_ra>
